<compile_context>
chip_gen: v5e
topology: v5e:2x2
jax: 0.10.0
libtpu: 0.0.40
codegen_flags: <defaults>
</compile_context>

<pallas_src>
import jax
import jax.numpy as jnp
from jax import lax
from jax.experimental import pallas as pl
from jax.experimental.pallas import tpu as pltpu

NEG_SLOPE = 0.01  # F.leaky_relu default negative_slope


def _leaky_relu(x):
    return jnp.where(x > 0, x, NEG_SLOPE * x)


def _round_up(x, m):
    return ((x + m - 1) // m) * m


def _cdiv(a, b):
    return -(-a // b)


def score_net_kernel(z_ref, w1_ref, w2_ref, w3t_ref, o_ref):
    # Layer 1 (~99% of FLOPs and bytes): cast the z tile to bf16 in-register (rides the
    # idle VPU slot, halves MXU feed bytes), (TB, 1000) @ (1000, 128) with f32 accumulate.
    zb = z_ref[...].astype(jnp.bfloat16)
    h = jnp.dot(zb, w1_ref[...], preferred_element_type=jnp.float32)
    h = _leaky_relu(h)
    # Layer 2: (TB, 128) @ (128, 128), bf16 operands, f32 accumulate.
    h = jnp.dot(h.astype(jnp.bfloat16), w2_ref[...],
                preferred_element_type=jnp.float32)
    h = _leaky_relu(h)
    # Layer 3, computed transposed so the scalar score per batch row is lane-dense:
    #   ot[n, b] = sum_k w3t[n, k] * h[b, k]   (contract last dims of both: q @ k.T pattern)
    ot = lax.dot_general(w3t_ref[...], h.astype(jnp.bfloat16),
                         dimension_numbers=(((1,), (1,)), ((), ())),
                         preferred_element_type=jnp.float32)
    o_ref[...] = _leaky_relu(ot)            # (8, TB); only rows < out_dim are meaningful


def score_net_pallas(z_feature, w1, w2, w3, *, tb_max=1024):
    """z_feature: (B, 1000); weights stored as (in, out). Returns (B, out_dim) f32 score."""
    B, F = z_feature.shape
    in1, d1 = w1.shape
    in2, d2 = w2.shape
    in3, d3 = w3.shape
    assert in1 == F and in2 == d1 and in3 == d2, "weight shapes must chain"
    assert d3 <= 8, "final layer width must fit the 8-sublane output tile"
    H1 = _round_up(d1, 128)   # 100 -> 128
    H2 = _round_up(d2, 128)   # 10  -> 128

    # Weight prep (tiny, ~400 KB total): bf16 + zero-pad to lane multiples; w3 stored
    # transposed so the final dot emits a lane-dense (8, TB) score tile.
    w1_p = jnp.zeros((F, H1), jnp.bfloat16).at[:, :d1].set(w1.astype(jnp.bfloat16))
    w2_p = jnp.zeros((H1, H2), jnp.bfloat16).at[:d1, :d2].set(w2.astype(jnp.bfloat16))
    w3t_p = jnp.zeros((8, H2), jnp.bfloat16).at[:d3, :d2].set(w3.T.astype(jnp.bfloat16))

    # Batch tiling: balanced tiles, multiples of 128 when there is more than one tile
    # (so the (8, TB) output block stays (8,128)-aligned); at least two tiles for
    # mid/large batches so both v7x TensorCores get work ("parallel" grid axis).
    if B > tb_max:
        n_tiles = _cdiv(B, tb_max)
    elif B > 256:
        n_tiles = 2
    else:
        n_tiles = 1
    if n_tiles == 1:
        TB = B                                # single full-array block: any B is legal
    else:
        TB = _round_up(_cdiv(B, n_tiles), 128)
        n_tiles = _cdiv(B, TB)                # last tile is a clamped boundary block

    flops = 2 * B * (F * H1 + H1 * H2 + H2 * 8)
    bytes_accessed = (B * F * z_feature.dtype.itemsize
                      + (F * H1 + H1 * H2 + 8 * H2) * 2
                      + 8 * B * 4)

    out = pl.pallas_call(
        score_net_kernel,
        out_shape=jax.ShapeDtypeStruct((8, B), jnp.float32),
        grid_spec=pltpu.PrefetchScalarGridSpec(
            num_scalar_prefetch=0,
            grid=(n_tiles,),
            in_specs=[
                pl.BlockSpec((TB, F), lambda i: (i, 0)),    # z: batch-tiled, unpadded f32
                pl.BlockSpec((F, H1), lambda i: (0, 0)),    # weights: VMEM-resident
                pl.BlockSpec((H1, H2), lambda i: (0, 0)),
                pl.BlockSpec((8, H2), lambda i: (0, 0)),
            ],
            out_specs=pl.BlockSpec((8, TB), lambda i: (0, i)),   # lane-dense score tile
        ),
        compiler_params=pltpu.CompilerParams(
            dimension_semantics=("parallel",),
            vmem_limit_bytes=48 * 1024 * 1024),
        cost_estimate=pl.CostEstimate(
            flops=flops, transcendentals=0, bytes_accessed=bytes_accessed),
    )(z_feature, w1_p, w2_p, w3t_p)

    return out[:d3, :].T                      # (B, d3)


def score_net_ref(z, w1, w2, w3):
    h = _leaky_relu(z @ w1)
    h = _leaky_relu(h @ w2)
    return _leaky_relu(h @ w3)


def score_net_ref_mixed(z, w1, w2, w3):
    # Reference matching the kernel's dtype choices (bf16 operands, f32 accumulation).
    bf = lambda a: a.astype(jnp.bfloat16).astype(jnp.float32)
    h = _leaky_relu(bf(z) @ bf(w1))
    h = _leaky_relu(bf(h) @ bf(w2))
    return _leaky_relu(bf(h) @ bf(w3))


def init_params(key):
    # MLP dims = [1000, 100, 10, 1]; nn.Linear(d_in, d_out, bias=False); stored (in, out).
    dims = [1000, 100, 10, 1]
    keys = jax.random.split(key, len(dims) - 1)
    params = []
    for k, d_in, d_out in zip(keys, dims[:-1], dims[1:]):
        bound = 1.0 / jnp.sqrt(jnp.float32(d_in))
        params.append(jax.random.uniform(k, (d_in, d_out), jnp.float32, -bound, bound))
    return params


if __name__ == "__main__":
    key = jax.random.PRNGKey(0)
    k_z, k_w = jax.random.split(key)

    B = 8  # small batch
    z_feature = jax.random.normal(k_z, (B, 1000), dtype=jnp.float32)
    w1, w2, w3 = init_params(k_w)

    score = score_net_pallas(z_feature, w1, w2, w3)
    score = jax.block_until_ready(score)
    assert score.shape == (B, 1)

    # Tight check vs. a reference using the same bf16 rounding / f32 accumulation.
    ref_mixed = score_net_ref_mixed(z_feature, w1, w2, w3)
    assert jnp.allclose(score, ref_mixed, atol=2e-3, rtol=2e-3), \
        "mismatch vs mixed-precision reference"

    # Loose sanity check vs. the pure-f32 PyTorch-equivalent math.
    ref_f32 = score_net_ref(z_feature, w1, w2, w3)
    assert jnp.allclose(score, ref_f32, atol=3e-2, rtol=3e-2), \
        "mismatch vs f32 reference"

    print("KERNEL_OK")
</pallas_src>

<mosaic_0001>
module attributes {stable_mosaic.version = 11 : i64} {
  func.func @score_net_kernel(%arg0: i32, %arg1: memref<8x1000xf32, #tpu.memory_space<vmem>>, %arg2: memref<1000x128xbf16, #tpu.memory_space<vmem>>, %arg3: memref<128x128xbf16, #tpu.memory_space<vmem>>, %arg4: memref<8x128xbf16, #tpu.memory_space<vmem>>, %arg5: memref<8x8xf32, #tpu.memory_space<vmem>>) attributes {dimension_semantics = [#tpu.dimension_semantics<parallel>], iteration_bounds = array<i64: 1>, scalar_prefetch = 0 : i64, scratch_operands = 0 : i64, tpu.core_type = #tpu.core_type<tc>, window_params = [{transform_indices = @transform_0, window_bounds = array<i64: 8, 1000>}, {pipeline_mode = #tpu.pipeline_mode<synchronous>, transform_indices = @transform_1, window_bounds = array<i64: 1000, 128>}, {pipeline_mode = #tpu.pipeline_mode<synchronous>, transform_indices = @transform_2, window_bounds = array<i64: 128, 128>}, {pipeline_mode = #tpu.pipeline_mode<synchronous>, transform_indices = @transform_3, window_bounds = array<i64: 8, 128>}, {transform_indices = @transform_4, window_bounds = array<i64: 8, 8>}]} {
    %c0 = arith.constant 0 : index
    %c0_0 = arith.constant 0 : index
    %0 = vector.load %arg1[%c0, %c0_0] : memref<8x1000xf32, #tpu.memory_space<vmem>>, vector<8x1000xf32>
    %1 = arith.truncf %0 : vector<8x1000xf32> to vector<8x1000xbf16>
    %c0_1 = arith.constant 0 : index
    %c0_2 = arith.constant 0 : index
    %2 = vector.load %arg2[%c0_1, %c0_2] : memref<1000x128xbf16, #tpu.memory_space<vmem>>, vector<1000x128xbf16>
    %cst = arith.constant dense<0.000000e+00> : vector<8x128xf32>
    %3 = tpu.matmul %1, %2, %cst {dimension_numbers = #tpu.dot_dimension_numbers<[1], [0], [0], [1], [0, 0, 1, 1], [], []>} : vector<8x1000xbf16>, vector<1000x128xbf16>, vector<8x128xf32> -> vector<8x128xf32>
    %cst_3 = arith.constant 0.000000e+00 : f32
    %4 = vector.broadcast %cst_3 : f32 to vector<8x128xf32>
    %5 = arith.cmpf ogt, %3, %4 : vector<8x128xf32>
    %cst_4 = arith.constant 0.00999999977 : f32
    %6 = vector.broadcast %cst_4 : f32 to vector<8x128xf32>
    %7 = arith.mulf %6, %3 : vector<8x128xf32>
    %8 = arith.select %5, %3, %7 : vector<8x128xi1>, vector<8x128xf32>
    %9 = arith.truncf %8 : vector<8x128xf32> to vector<8x128xbf16>
    %c0_5 = arith.constant 0 : index
    %c0_6 = arith.constant 0 : index
    %10 = vector.load %arg3[%c0_5, %c0_6] : memref<128x128xbf16, #tpu.memory_space<vmem>>, vector<128x128xbf16>
    %cst_7 = arith.constant dense<0.000000e+00> : vector<8x128xf32>
    %11 = tpu.matmul %9, %10, %cst_7 {dimension_numbers = #tpu.dot_dimension_numbers<[1], [0], [0], [1], [0, 0, 1, 1], [], []>} : vector<8x128xbf16>, vector<128x128xbf16>, vector<8x128xf32> -> vector<8x128xf32>
    %cst_8 = arith.constant 0.000000e+00 : f32
    %12 = vector.broadcast %cst_8 : f32 to vector<8x128xf32>
    %13 = arith.cmpf ogt, %11, %12 : vector<8x128xf32>
    %cst_9 = arith.constant 0.00999999977 : f32
    %14 = vector.broadcast %cst_9 : f32 to vector<8x128xf32>
    %15 = arith.mulf %14, %11 : vector<8x128xf32>
    %16 = arith.select %13, %11, %15 : vector<8x128xi1>, vector<8x128xf32>
    %c0_10 = arith.constant 0 : index
    %c0_11 = arith.constant 0 : index
    %17 = vector.load %arg4[%c0_10, %c0_11] : memref<8x128xbf16, #tpu.memory_space<vmem>>, vector<8x128xbf16>
    %18 = arith.truncf %16 : vector<8x128xf32> to vector<8x128xbf16>
    %cst_12 = arith.constant dense<0.000000e+00> : vector<8x8xf32>
    %19 = tpu.matmul %17, %18, %cst_12 {dimension_numbers = #tpu.dot_dimension_numbers<[1], [1], [0], [0], [0, 0, 1, 0], [], []>} : vector<8x128xbf16>, vector<8x128xbf16>, vector<8x8xf32> -> vector<8x8xf32>
    %cst_13 = arith.constant 0.000000e+00 : f32
    %20 = vector.broadcast %cst_13 : f32 to vector<8x8xf32>
    %21 = arith.cmpf ogt, %19, %20 : vector<8x8xf32>
    %cst_14 = arith.constant 0.00999999977 : f32
    %22 = vector.broadcast %cst_14 : f32 to vector<8x8xf32>
    %23 = arith.mulf %22, %19 : vector<8x8xf32>
    %24 = arith.select %21, %19, %23 : vector<8x8xi1>, vector<8x8xf32>
    %c0_15 = arith.constant 0 : index
    %c0_16 = arith.constant 0 : index
    %25 = vector.load %arg5[%c0_15, %c0_16] : memref<8x8xf32, #tpu.memory_space<vmem>>, vector<8x8xf32>
    tpu.vector_store %arg5[%c0_15, %c0_16], %24 {strides = array<i32>} : memref<8x8xf32, #tpu.memory_space<vmem>>, vector<8x8xf32>,
    return
  }
  func.func @transform_0(%arg0: i32) -> (i32, i32) {
    %c0_i32 = arith.constant 0 : i32
    %c0_i32_0 = arith.constant 0 : i32
    return %arg0, %c0_i32 : i32, i32
  }
  func.func @transform_1(%arg0: i32) -> (i32, i32) {
    %c0_i32 = arith.constant 0 : i32
    %c0_i32_0 = arith.constant 0 : i32
    %c0_i32_1 = arith.constant 0 : i32
    return %c0_i32, %c0_i32_0 : i32, i32
  }
  func.func @transform_2(%arg0: i32) -> (i32, i32) {
    %c0_i32 = arith.constant 0 : i32
    %c0_i32_0 = arith.constant 0 : i32
    %c0_i32_1 = arith.constant 0 : i32
    return %c0_i32, %c0_i32_0 : i32, i32
  }
  func.func @transform_3(%arg0: i32) -> (i32, i32) {
    %c0_i32 = arith.constant 0 : i32
    %c0_i32_0 = arith.constant 0 : i32
    %c0_i32_1 = arith.constant 0 : i32
    return %c0_i32, %c0_i32_0 : i32, i32
  }
  func.func @transform_4(%arg0: i32) -> (i32, i32) {
    %c0_i32 = arith.constant 0 : i32
    %c0_i32_0 = arith.constant 0 : i32
    return %c0_i32, %arg0 : i32, i32
  }
}

</mosaic_0001>

<bundles_post_ra>
// kernel: tpu_custom_call.1
= control target key start
LH: loop header
LB: loop body
LE: loop exit
PB: predicated region body
PF: predicated region fallthrough
CT: control target
= control target key end

     0   :  { %9 = vsyncpa [#allocation3], 0  ;;  %s1362_s0 = inlined_call_operand.hbm [shape: f32[8,1000], index: 0, kind: input, shape index: {}]   ;;  %s1363_s1 = inlined_call_operand.hbm [shape: bf16[1000,128], index: 1, kind: input, shape index: {}]   ;;  %s1364_s2 = inlined_call_operand.hbm [shape: bf16[128,128], index: 2, kind: input, shape index: {}]   ;;  %s1365_s3 = inlined_call_operand.hbm [shape: bf16[8,128], index: 3, kind: input, shape index: {}]   ;;  %s1366_s4 = inlined_call_operand.hbm [shape: f32[8,8], index: 4, kind: output, shape index: {}]  }
   0x1   :  { %10 = vsyncpa [#allocation6], 0 }
   0x2   :  { %11 = vsyncpa [#allocation9], 0  ;;  %s28_s17 = sshll.u32 %s1363_s1, 4  ;;  %s29_s17 = int_to_ptr.hbm [resolvable:$true] %s28_s17 }
   0x3   :  { %12 = vsyncpa [#allocation4], 0  ;;  %s1315_s18 = smov [#allocation5]   ;;  %s18_s22 = sshll.u32 %s1362_s0, 4  ;;  %s19_s22 = int_to_ptr.hbm [resolvable:$true] %s18_s22 }
   0x4   :  { %s30_s19 = sshll.u32 %s1315_s18, 4  ;;  %s1316_s23 = smov 64   ;;  %s31_s19 = int_to_ptr.vmem [resolvable:$true] %s30_s19 }
   0x5   :  { %s1317_s24 = smov 4   ;;  %s1318_s25 = smov [#allocation2]  }
   0x6   :  { %36 = dma.hbm_to_vmem [thread:$0]  %s29_s17, 8000, %s31_s19, [#allocation6], %s1316_s23, %s1316_s23, %s1317_s24  }
   0x7   :  { %s20_s26 = sshll.u32 %s1318_s25, 4  ;;  %s41_s29 = sshll.u32 %s1364_s2, 4  ;;  %s21_s26 = int_to_ptr.vmem [resolvable:$true] %s20_s26  ;;  %s42_s29 = int_to_ptr.hbm [resolvable:$true] %s41_s29 }
   0x8   :  { %23 = dma.hbm_to_vmem [thread:$0]  %s19_s22, 1024, %s21_s26, [#allocation3]  }
   0x9   :  { %s55_s5 = sshll.u32 %s1365_s3, 4  ;;  %s1319_s6 = smov [#allocation7]   ;;  %s56_s5 = int_to_ptr.hbm [resolvable:$true] %s55_s5 }
   0xa   :  { %s43_s7 = sshll.u32 %s1319_s6, 4  ;;  %s1320_s0 = smov [#allocation8]   ;;  %s44_s7 = int_to_ptr.vmem [resolvable:$true] %s43_s7 }
   0xb   :  { %49 = dma.hbm_to_vmem [thread:$0]  %s42_s29, 1024, %s44_s7, [#allocation6], %s1316_s23, %s1316_s23, %s1317_s24  }
   0xc   :  { %s57_s8 = sshll.u32 %s1320_s0, 4  ;;  %s58_s8 = int_to_ptr.vmem [resolvable:$true] %s57_s8 }
   0xd   :  { %60 = dma.hbm_to_vmem [thread:$0]  %s56_s5, 64, %s58_s8, [#allocation9]  }
   0xe   :  { %1307 = dma.done.wait [#allocation3], 1024  }
   0xf   :  { %1308 = vsyncadd [#allocation3], 4294966272 }
  0x10   :  { %1309 = dma.done.wait [#allocation6], 9024  }
  0x11   :  { %1310 = vsyncadd [#allocation6], 4294958272 }
  0x12   :  { %1311 = dma.done.wait [#allocation9], 64  }
  0x13   :  { %1312 = vsyncadd [#allocation9], 4294967232  ;;  %v1117_v0 = vld [vmem:[#allocation5 + $0x38] sm:$0xff]  ;;  %v1116_v4 = vld [vmem:[#allocation5 + $0x30] sm:$0xff]  ;;  %vm598_vm0 = vcmask 1043456   ;;  %vm594_vm1 = vcmask 850944  }
  0x14   :  { %v1125_v1 = vld [vmem:[#allocation5 + $0x78] sm:$0xff]  ;;  %602 = vmatpush.bf16.msra.mxu0 %v1117_v0  ;;  %v1124_v5 = vld [vmem:[#allocation5 + $0x70] sm:$0xff]  ;;  %v1115_v8 = vld [vmem:[#allocation5 + $0x28] sm:$0xff]  ;;  %s1321_s2 = smov [#allocation10]   ;;  %s817_s11 = sshll.u32 %s1366_s4, 4  ;;  %vm808_vm5 = vcmask 64512   ;;  %s818_s11 = int_to_ptr.hbm [resolvable:$true] %s817_s11 }
  0x15   :  { %v1133_v2 = vld [vmem:[#allocation5 + $0xb8] sm:$0xff]  ;;  %615 = vmatpush.bf16.msra.mxu1 %v1125_v1  ;;  %v1132_v6 = vld [vmem:[#allocation5 + $0xb0] sm:$0xff]  ;;  %v1123_v9 = vld [vmem:[#allocation5 + $0x68] sm:$0xff]  ;;  %s815_s3 = sshll.u32 %s1321_s2, 4  ;;  %s816_s3 = int_to_ptr.vmem [resolvable:$true] %s815_s3 }
  0x16   :  { %v1141_v3 = vld [vmem:[#allocation5 + $0xf8] sm:$0xff]  ;;  %628 = vmatpush.bf16.msra.mxu2 %v1133_v2  ;;  %v1140_v7 = vld [vmem:[#allocation5 + $0xf0] sm:$0xff]  ;;  %v1131_v10 = vld [vmem:[#allocation5 + $0xa8] sm:$0xff] }
  0x17   :  { %641 = vmatpush.bf16.msra.mxu3 %v1141_v3  ;;  %v1139_v11 = vld [vmem:[#allocation5 + $0xe8] sm:$0xff]  ;;  %v1114_v12 = vld [vmem:[#allocation5 + $0x20] sm:$0xff]  ;;  %v1113_v16 = vld [vmem:[#allocation5 + $0x18] sm:$0xff] }
  0x18   :  { %603 = vmatpush.bf16.msra.mxu0 %v1116_v4  ;;  %v1122_v13 = vld [vmem:[#allocation5 + $0x60] sm:$0xff]  ;;  %v1121_v17 = vld [vmem:[#allocation5 + $0x58] sm:$0xff]  ;;  %v1112_v20 = vld [vmem:[#allocation5 + $0x10] sm:$0xff] }
  0x19   :  { %616 = vmatpush.bf16.msra.mxu1 %v1124_v5  ;;  %v1130_v14 = vld [vmem:[#allocation5 + $0xa0] sm:$0xff]  ;;  %v1129_v18 = vld [vmem:[#allocation5 + $0x98] sm:$0xff]  ;;  %v1120_v21 = vld [vmem:[#allocation5 + $0x50] sm:$0xff] }
  0x1a   :  { %629 = vmatpush.bf16.msra.mxu2 %v1132_v6  ;;  %v1138_v15 = vld [vmem:[#allocation5 + $0xe0] sm:$0xff]  ;;  %v1137_v19 = vld [vmem:[#allocation5 + $0xd8] sm:$0xff]  ;;  %v1128_v22 = vld [vmem:[#allocation5 + $0x90] sm:$0xff] }
  0x1b   :  { %642 = vmatpush.bf16.msra.mxu3 %v1140_v7  ;;  %v1136_v23 = vld [vmem:[#allocation5 + $0xd0] sm:$0xff]  ;;  %v1111_v25 = vld [vmem:[#allocation5 + $0x8] sm:$0xff]  ;;  %v1110_v30 = vld [vmem:[#allocation5] sm:$0xff] }
  0x1c   :  { %604 = vmatpush.bf16.msra.mxu0 %v1115_v8  ;;  %v218_v24 = vld [vmem:[#allocation5 + $0x1f0] sm:$0xf]  ;;  %v1119_v26 = vld [vmem:[#allocation5 + $0x48] sm:$0xff]  ;;  %v1118_v31 = vld [vmem:[#allocation5 + $0x40] sm:$0xff] }
  0x1d   :  { %617 = vmatpush.bf16.msra.mxu1 %v1123_v9  ;;  %v468_v27 = vunpack.c.l.b16 %v218_v24  ;;  %v1127_v28 = vld [vmem:[#allocation5 + $0x88] sm:$0xff]  ;;  %v1126_v32 = vld [vmem:[#allocation5 + $0x80] sm:$0xff]  ;;  %v1149_v35 = vld [vmem:[#allocation5 + $0x138] sm:$0xff] }
  0x1e   :  { %630 = vmatpush.bf16.msra.mxu2 %v1131_v10  ;;  %v1135_v29 = vld [vmem:[#allocation5 + $0xc8] sm:$0xff]  ;;  %v1134_v33 = vld [vmem:[#allocation5 + $0xc0] sm:$0xff]  ;;  %v80_v36 = vld [vmem:[#allocation2 + $0x10] sm:$0xff] }
  0x1f   :  { %643 = vmatpush.bf16.msra.mxu3 %v1139_v11  ;;  %v531_v34 = vpack.c.b16 %v468_v27, %v468_v27  ;;  %v78_v37 = vld [vmem:[#allocation2] sm:$0xff]  ;;  %v1157_v38 = vld [vmem:[#allocation5 + $0x178] sm:$0xff]  ;;  %v79_v40 = vld [vmem:[#allocation2 + $0x8] sm:$0xff]  ;;  %v88_v43 = vpack.c.bf16 %v80_v36, %v80_v36 }
  0x20   :  { %605 = vmatpush.bf16.msra.mxu0 %v1114_v12  ;;  %v81_v39 = vld [vmem:[#allocation2 + $0x18] sm:$0xff]  ;;  %v86_v44 = vpack.c.bf16 %v78_v37, %v78_v37  ;;  %v87_v46 = vpack.c.bf16 %v79_v40, %v79_v40  ;;  %v1148_v47 = vld [vmem:[#allocation5 + $0x130] sm:$0xff]  ;;  %v1171_v50 = vld [vmem:[#allocation5 + $0x1e8] sm:$0xff] }
  0x21   :  { %618 = vmatpush.bf16.msra.mxu1 %v1122_v13  ;;  %v1165_v41 = vld [vmem:[#allocation5 + $0x1b8] sm:$0xff]  ;;  %v600_v42 = vsel %vm598_vm0, %v531_v34, 0  ;;  %v89_v45 = vpack.c.bf16 %v81_v39, %v81_v39  ;;  %v1156_v48 = vld [vmem:[#allocation5 + $0x170] sm:$0xff]  ;;  %v1147_v51 = vld [vmem:[#allocation5 + $0x128] sm:$0xff] }
  0x22   :  { %631 = vmatpush.bf16.msra.mxu2 %v1130_v14  ;;  %v1164_v49 = vld [vmem:[#allocation5 + $0x1b0] sm:$0xff]  ;;  %v1155_v52 = vld [vmem:[#allocation5 + $0x168] sm:$0xff]  ;;  %v1170_v54 = vld [vmem:[#allocation5 + $0x1e0] sm:$0xff] }
  0x23   :  { %644 = vmatpush.bf16.msra.mxu3 %v1138_v15  ;;  %v1163_v53 = vld [vmem:[#allocation5 + $0x1a8] sm:$0xff]  ;;  %v1146_v55 = vld [vmem:[#allocation5 + $0x120] sm:$0xff]  ;;  %v1169_v58 = vld [vmem:[#allocation5 + $0x1d8] sm:$0xff] }
  0x24   :  { %606 = vmatpush.bf16.msra.mxu0 %v1113_v16  ;;  %v1154_v56 = vld [vmem:[#allocation5 + $0x160] sm:$0xff]  ;;  %v1145_v59 = vld [vmem:[#allocation5 + $0x118] sm:$0xff]  ;;  %v1168_v62 = vld [vmem:[#allocation5 + $0x1d0] sm:$0xff] }
  0x25   :  { %619 = vmatpush.bf16.msra.mxu1 %v1121_v17  ;;  %v1162_v57 = vld [vmem:[#allocation5 + $0x1a0] sm:$0xff]  ;;  %v1153_v60 = vld [vmem:[#allocation5 + $0x158] sm:$0xff]  ;;  %v1144_v63 = vld [vmem:[#allocation5 + $0x110] sm:$0xff] }
  0x26   :  { %632 = vmatpush.bf16.msra.mxu2 %v1129_v18  ;;  %v1161_v61 = vld [vmem:[#allocation5 + $0x198] sm:$0xff]  ;;  %v1152_v0 = vld [vmem:[#allocation5 + $0x150] sm:$0xff]  ;;  %v1167_v2 = vld [vmem:[#allocation5 + $0x1c8] sm:$0xff] }
  0x27   :  { %645 = vmatpush.bf16.msra.mxu3 %v1137_v19  ;;  %v1160_v1 = vld [vmem:[#allocation5 + $0x190] sm:$0xff]  ;;  %v1143_v3 = vld [vmem:[#allocation5 + $0x108] sm:$0xff]  ;;  %v1166_v6 = vld [vmem:[#allocation5 + $0x1c0] sm:$0xff] }
  0x28   :  { %607 = vmatpush.bf16.msra.mxu0 %v1112_v20  ;;  %v1151_v4 = vld [vmem:[#allocation5 + $0x148] sm:$0xff]  ;;  %v85_v7 = vld [vmem:[#allocation2 + $0x38] sm:$0xff]  ;;  %v1142_v9 = vld [vmem:[#allocation5 + $0x100] sm:$0xff] }
  0x29   :  { %620 = vmatpush.bf16.msra.mxu1 %v1120_v21  ;;  %v1159_v5 = vld [vmem:[#allocation5 + $0x188] sm:$0xff]  ;;  %v93_v8 = vpack.c.bf16 %v85_v7, %v85_v7  ;;  %v1150_v10 = vld [vmem:[#allocation5 + $0x140] sm:$0xff]  ;;  %v84_v14 = vld [vmem:[#allocation2 + $0x30] sm:$0xff] }
  0x2a   :  { %633 = vmatpush.bf16.msra.mxu2 %v1128_v22  ;;  %v82_v11 = vld [vmem:[#allocation2 + $0x20] sm:$0xff]  ;;  %v83_v13 = vld [vmem:[#allocation2 + $0x28] sm:$0xff]  ;;  %v92_v17 = vpack.c.bf16 %v84_v14, %v84_v14  ;;  %v1176_v21 = vld [vmem:[#allocation7 + $0x20] sm:$0xff] }
  0x2b   :  { %646 = vmatpush.bf16.msra.mxu3 %v1136_v23  ;;  %v1158_v12 = vld [vmem:[#allocation5 + $0x180] sm:$0xff]  ;;  %v90_v15 = vpack.c.bf16 %v82_v11, %v82_v11  ;;  %v91_v16 = vpack.c.bf16 %v83_v13, %v83_v13  ;;  %v1179_v18 = vld [vmem:[#allocation7 + $0x38] sm:$0xff] }
  0x2c   :  { %608 = vmatpush.bf16.msra.mxu0 %v1111_v25  ;;  %v1178_v19 = vld [vmem:[#allocation7 + $0x30] sm:$0xff]  ;;  %v1177_v20 = vld [vmem:[#allocation7 + $0x28] sm:$0xff]  ;;  %v1175_v22 = vld [vmem:[#allocation7 + $0x18] sm:$0xff] }
  0x2d   :  { %621 = vmatpush.bf16.msra.mxu1 %v1119_v26  ;;  %v1174_v24 = vld [vmem:[#allocation7 + $0x10] sm:$0xff]  ;;  %v1173_v26 = vld [vmem:[#allocation7 + $0x8] sm:$0xff] }
  0x2e   :  { %634 = vmatpush.bf16.msra.mxu2 %v1127_v28 }
  0x2f   :  { %647 = vmatpush.bf16.msra.mxu3 %v1135_v29 }
  0x30   :  { %609 = vmatpush.bf16.msra.mxu0 %v1110_v30 }
  0x31   :  { %622 = vmatpush.bf16.msra.mxu1 %v1118_v31  ;;  %v1172_v31 = vld [vmem:[#allocation7] sm:$0xff] }
  0x32   :  { %635 = vmatpush.bf16.msra.mxu2 %v1126_v32 }
  0x33   :  { %648 = vmatpush.bf16.msra.mxu3 %v1134_v33  ;;  %610 = vmatmul.bf16.vlgmr.msra.gmra.mxu0 %v86_v44 }
  0x34   :  { %654 = vmatpush.bf16.msrb.mxu0 %v1149_v35  ;;  %623 = vmatmul.bf16.vlgmr.msra.gmra.mxu1 %v87_v46 }
  0x35   :  { %667 = vmatpush.bf16.msrb.mxu1 %v1157_v38  ;;  %636 = vmatmul.bf16.vlgmr.msra.gmra.mxu2 %v88_v43 }
  0x36   :  { %680 = vmatpush.bf16.msrb.mxu2 %v1165_v41  ;;  %649 = vmatmul.bf16.vlgmr.msra.gmra.mxu3 %v89_v45 }
  0x37   :  { %694 = vmatpush.bf16.msrb.mxu3 %v600_v42 }
  0x38   :  { %655 = vmatpush.bf16.msrb.mxu0 %v1148_v47 }
  0x39   :  { %668 = vmatpush.bf16.msrb.mxu1 %v1156_v48 }
  0x3a   :  { %681 = vmatpush.bf16.msrb.mxu2 %v1164_v49 }
  0x3b   :  { %695 = vmatpush.bf16.msrb.mxu3 %v1171_v50 }
  0x3c   :  { %656 = vmatpush.bf16.msrb.mxu0 %v1147_v51 }
  0x3d   :  { %669 = vmatpush.bf16.msrb.mxu1 %v1155_v52 }
  0x3e   :  { %682 = vmatpush.bf16.msrb.mxu2 %v1163_v53 }
  0x3f   :  { %696 = vmatpush.bf16.msrb.mxu3 %v1170_v54 }
  0x40   :  { %657 = vmatpush.bf16.msrb.mxu0 %v1146_v55 }
  0x41   :  { %670 = vmatpush.bf16.msrb.mxu1 %v1154_v56 }
  0x42   :  { %683 = vmatpush.bf16.msrb.mxu2 %v1162_v57  ;;  %v790_v57 = vld [vmem:[#allocation8] sm:$0xf] }
  0x43   :  { %697 = vmatpush.bf16.msrb.mxu3 %v1169_v58 }
  0x44   :  { %658 = vmatpush.bf16.msrb.mxu0 %v1145_v59 }
  0x45   :  { %671 = vmatpush.bf16.msrb.mxu1 %v1153_v60 }
  0x46   :  { %684 = vmatpush.bf16.msrb.mxu2 %v1161_v61 }
  0x47   :  { %698 = vmatpush.bf16.msrb.mxu3 %v1168_v62 }
  0x48   :  { %659 = vmatpush.bf16.msrb.mxu0 %v1144_v63 }
  0x49   :  { %672 = vmatpush.bf16.msrb.mxu1 %v1152_v0 }
  0x4a   :  { %685 = vmatpush.bf16.msrb.mxu2 %v1160_v1 }
  0x4b   :  { %699 = vmatpush.bf16.msrb.mxu3 %v1167_v2 }
  0x4c   :  { %660 = vmatpush.bf16.msrb.mxu0 %v1143_v3 }
  0x4d   :  { %673 = vmatpush.bf16.msrb.mxu1 %v1151_v4 }
  0x4e   :  { %686 = vmatpush.bf16.msrb.mxu2 %v1159_v5 }
  0x4f   :  { %700 = vmatpush.bf16.msrb.mxu3 %v1166_v6 }
  0x50   :  { %661 = vmatpush.bf16.msrb.mxu0 %v1142_v9 }
  0x51   :  { %674 = vmatpush.bf16.msrb.mxu1 %v1150_v10 }
  0x52   :  { %1077 = vmatmul.msk.bf16.vlgmr.msrb.gmra.mxu3 %vm594_vm1, %v93_v8  ;;  %687 = vmatpush.bf16.msrb.mxu2 %v1158_v12 }
  0x53   :  { %662 = vmatmul.bf16.vlgmr.msrb.gmra.mxu0 %v90_v15  ;;  %774 = vmatpush.bf16.msra.mxu3 %v1179_v18 }
  0x54   :  { %675 = vmatmul.bf16.vlgmr.msrb.gmra.mxu1 %v91_v16 }
  0x55   :  { %688 = vmatmul.bf16.vlgmr.msrb.gmra.mxu2 %v92_v17 }
  0x57   :  { %775 = vmatpush.bf16.msra.mxu3 %v1178_v19 }
  0x5b   :  { %776 = vmatpush.bf16.msra.mxu3 %v1177_v20 }
  0x5f   :  { %777 = vmatpush.bf16.msra.mxu3 %v1176_v21 }
  0x63   :  { %778 = vmatpush.bf16.msra.mxu3 %v1175_v22 }
  0x67   :  { %779 = vmatpush.bf16.msra.mxu3 %v1174_v24 }
  0x6b   :  { %780 = vmatpush.bf16.msra.mxu3 %v1173_v26 }
  0x6f   :  { %781 = vmatpush.bf16.msra.mxu3 %v1172_v31 }
  0xb0   :  { %v611_v23 = vpop.f32.mrf.mxu0 }
  0xb1   :  { %v624_v25 = vpop.f32.mrf.mxu1 }
  0xb2   :  { %v625_v34 = vadd.f32 %v624_v25, %v611_v23 }
  0xb8   :  { %v637_v27 = vpop.f32.mrf.mxu2  ;;  %v613_v29 = vpop.f32.mrf.mxu0 }
  0xb9   :  { %v650_v28 = vpop.f32.mrf.mxu3  ;;  %v626_v30 = vpop.f32.mrf.mxu1  ;;  %v638_v35 = vadd.f32 %v637_v27, %v625_v34 }
  0xbb   :  { %v651_v36 = vadd.f32 %v650_v28, %v638_v35 }
  0xc0   :  { %v639_v32 = vpop.f32.mrf.mxu2 }
  0xc1   :  { %v652_v33 = vpop.f32.mrf.mxu3 }
  0xd0   :  { %v663_v37 = vpop.f32.mrf.mxu0 }
  0xd1   :  { %v676_v38 = vpop.f32.mrf.mxu1  ;;  %v664_v39 = vadd.f32 %v663_v37, %v651_v36 }
  0xd3   :  { %v677_v41 = vadd.f32 %v676_v38, %v664_v39 }
  0xd5   :  { %v702_v40 = vpop.f32.mrf.mxu3 }
  0xd8   :  { %v689_v42 = vpop.f32.mrf.mxu2  ;;  %v665_v44 = vpop.f32.mrf.mxu0 }
  0xd9   :  { %v690_v43 = vadd.f32 %v689_v42, %v677_v41  ;;  %v678_v45 = vpop.f32.mrf.mxu1 }
  0xdb   :  { %v703_v46 = vadd.f32 %v702_v40, %v690_v43 }
  0xdd   :  { %v704_v47 = vpop.f32.mrf.mxu3  ;;  %vm706_vm2 = vcmp.gt.f32.partialorder %v703_v46, 0.0  ;;  %v707_v48 = vmul.f32 0.01, %v703_v46 }
  0xdf   :  { %v708_v49 = vsel %vm706_vm2, %v703_v46, %v707_v48 }
  0xe0   :  { %v709_v50 = vpack.c.bf16 %v708_v49, %v708_v49  ;;  %v691_v51 = vpop.f32.mrf.mxu2 }
  0xe2   :  { %782 = vmatmul.bf16.vlgmr.msra.gmra.mxu3 %v709_v50 }
 0x165   :  { %v783_v52 = vpop.f32.mrf.mxu3 }
 0x166   :  { %vm787_vm3 = vcmp.gt.f32.partialorder %v783_v52, 0.0  ;;  %v788_v53 = vmul.f32 0.01, %v783_v52 }
 0x168   :  { %v789_v54 = vsel %vm787_vm3, %v783_v52, %v788_v53 }
 0x169   :  { %v791_v55 = vpack.c.bf16 %v789_v54, %v789_v54 }
 0x16b   :  { %799 = vmatpush.bf16.xpose.msra.mxu0 %v791_v55 }
 0x16d   :  { %v785_v56 = vpop.f32.mrf.mxu3 }
 0x172   :  { %800 = vmatmul.bf16.vlgmr.msra.gmra.mxu0 %v790_v57 }
 0x1ef   :  { %v801_v58 = vpop.f32.mrf.mxu0 }
 0x1f0   :  { %vm805_vm4 = vcmp.gt.f32.partialorder %v801_v58, 0.0  ;;  %v806_v59 = vmul.f32 0.01, %v801_v58 }
 0x1f2   :  { %v807_v60 = vsel %vm805_vm4, %v801_v58, %v806_v59 }
 0x1f3   :  { %809 = vst.msk [vmem:[#allocation10] sm:$0xff] %vm808_vm5, %v807_v60 }
 0x1f4   :  { %820 = dma.vmem_to_hbm [thread:$0]  %s816_s3, 128, %s818_s11, [#allocation4]  }
 0x1f7   :  { %v803_v61 = vpop.f32.mrf.mxu0 }
 0x1f8   :  { %1313 = dma.done.wait [#allocation4], 128  }
 0x1f9   :  { %1314 = vsyncadd [#allocation4], 4294967168 }
 0x1fa   :  { %825 = vsyncpa [#allocation3], 1 }
 0x1fb   :  { %826 = vsyncpa [#allocation6], 1 }
 0x1fc   :  { %827 = vsyncpa [#allocation9], 1 }
 0x1fd   :  { %828 = vsyncpa [#allocation4], 1 }

</bundles_post_ra>
